<compile_context>
chip_gen: v6e
topology: v6e:2x2x1
jax: 0.10.0
libtpu: 0.0.40
codegen_flags: <defaults>
</compile_context>

<pallas_src>
import functools
from dataclasses import dataclass
from typing import Optional, List, Tuple

import jax
import jax.numpy as jnp
from jax.experimental import pallas as pl
from jax.experimental.pallas import tpu as pltpu


_VMEM_LIMIT = 48 * 1024 * 1024  # explicit per-kernel scoped-VMEM budget


def _fit(dim, target):
    """Tile size: `target` (a multiple of 128) if it divides dim, else full dim.

    Either choice satisfies the (8, 128) block constraint.
    """
    return target if (dim >= target and dim % target == 0) else dim


def _cparams(*sem):
    return pltpu.CompilerParams(dimension_semantics=sem,
                                vmem_limit_bytes=_VMEM_LIMIT)


# ----------------------------- Pallas kernels -----------------------------

def _matmul_kernel(x_ref, w_ref, o_ref, acc_ref):
    @pl.when(pl.program_id(2) == 0)
    def _():
        acc_ref[...] = jnp.zeros_like(acc_ref)

    acc_ref[...] += jnp.dot(x_ref[...], w_ref[...],
                            preferred_element_type=jnp.float32)

    @pl.when(pl.program_id(2) == pl.num_programs(2) - 1)
    def _():
        o_ref[...] = acc_ref[...].astype(o_ref.dtype)


def matmul(x, w, *, tm=256, tn=256, tk=512):
    """Tiled x @ w with f32 accumulation.  x: [M, K] bf16, w: [K, N] bf16."""
    M, K = x.shape
    _, N = w.shape
    tm, tn, tk = _fit(M, tm), _fit(N, tn), _fit(K, tk)
    return pl.pallas_call(
        _matmul_kernel,
        out_shape=jax.ShapeDtypeStruct((M, N), x.dtype),
        grid=(M // tm, N // tn, K // tk),
        in_specs=[pl.BlockSpec((tm, tk), lambda i, j, k: (i, k)),
                  pl.BlockSpec((tk, tn), lambda i, j, k: (k, j))],
        out_specs=pl.BlockSpec((tm, tn), lambda i, j, k: (i, j)),
        scratch_shapes=[pltpu.VMEM((tm, tn), jnp.float32)],
        compiler_params=_cparams("parallel", "parallel", "arbitrary"),
    )(x, w)


def _rms_matmul_kernel(x_ref, g_ref, w_ref, o_ref, *, eps):
    x = x_ref[...].astype(jnp.float32)
    var = jnp.mean(x * x, axis=-1, keepdims=True)
    xn = (x * jax.lax.rsqrt(var + eps)) * g_ref[...].astype(jnp.float32)
    o_ref[...] = jnp.dot(xn.astype(w_ref.dtype), w_ref[...],
                         preferred_element_type=jnp.float32).astype(o_ref.dtype)


def rms_matmul(x, g, w, eps, *, tm=256, tn=256):
    """Fused RMSNorm(x) @ w.  K (= hidden) is held as a single block."""
    M, K = x.shape
    _, N = w.shape
    tm, tn = _fit(M, tm), _fit(N, tn)
    return pl.pallas_call(
        functools.partial(_rms_matmul_kernel, eps=eps),
        out_shape=jax.ShapeDtypeStruct((M, N), x.dtype),
        grid=(M // tm, N // tn),
        in_specs=[pl.BlockSpec((tm, K), lambda i, j: (i, 0)),
                  pl.BlockSpec((1, K), lambda i, j: (0, 0)),
                  pl.BlockSpec((K, tn), lambda i, j: (0, j))],
        out_specs=pl.BlockSpec((tm, tn), lambda i, j: (i, j)),
        compiler_params=_cparams("parallel", "parallel"),
    )(x, g.reshape(1, -1), w)


def _rms_gate_up_kernel(x_ref, g_ref, wg_ref, wu_ref, o_ref, *, eps):
    x = x_ref[...].astype(jnp.float32)
    var = jnp.mean(x * x, axis=-1, keepdims=True)
    xn = ((x * jax.lax.rsqrt(var + eps)) *
          g_ref[...].astype(jnp.float32)).astype(wg_ref.dtype)
    gate = jnp.dot(xn, wg_ref[...], preferred_element_type=jnp.float32)
    up = jnp.dot(xn, wu_ref[...], preferred_element_type=jnp.float32)
    o_ref[...] = (gate * jax.nn.sigmoid(gate) * up).astype(o_ref.dtype)


def rms_gate_up(x, g, wg, wu, eps, *, tm=256, tn=256):
    """Fused RMSNorm + gate/up projections + SiLU(gate)*up, tiled over (M, I)."""
    M, K = x.shape
    _, N = wg.shape
    tm, tn = _fit(M, tm), _fit(N, tn)
    return pl.pallas_call(
        functools.partial(_rms_gate_up_kernel, eps=eps),
        out_shape=jax.ShapeDtypeStruct((M, N), x.dtype),
        grid=(M // tm, N // tn),
        in_specs=[pl.BlockSpec((tm, K), lambda i, j: (i, 0)),
                  pl.BlockSpec((1, K), lambda i, j: (0, 0)),
                  pl.BlockSpec((K, tn), lambda i, j: (0, j)),
                  pl.BlockSpec((K, tn), lambda i, j: (0, j))],
        out_specs=pl.BlockSpec((tm, tn), lambda i, j: (i, j)),
        compiler_params=_cparams("parallel", "parallel"),
    )(x, g.reshape(1, -1), wg, wu)


def _flash_attn_kernel(qpos_ref, qseq_ref, kpos_ref, kseq_ref,
                       q_ref, k_ref, v_ref, o_ref,
                       m_sc, l_sc, acc_sc, *, scale, window):
    ki = pl.program_id(2)

    @pl.when(ki == 0)
    def _():
        m_sc[...] = jnp.full_like(m_sc, -1e30)
        l_sc[...] = jnp.zeros_like(l_sc)
        acc_sc[...] = jnp.zeros_like(acc_sc)

    q = q_ref[0] * scale                       # (tq*groups, D) bf16, pre-scaled
    k = k_ref[0]                               # (tk, D) bf16
    # QK^T without transposing K (contract on the head dim directly).
    s = jax.lax.dot_general(q, k, (((1,), (1,)), ((), ())),
                            preferred_element_type=jnp.float32)  # (tq*g, tk) f32

    # Causal + same-sequence + sliding-window mask built in-kernel.
    qp = qpos_ref[...]                         # (tq*groups, 1) int32
    kp = kpos_ref[...]                         # (1, tk) int32
    allowed = (qseq_ref[...] == kseq_ref[...]) & (kp <= qp)
    if window > 0:
        allowed = allowed & ((qp - kp) <= window)

    s = jnp.where(allowed, s, -1e30)
    m_prev = m_sc[...]
    m_new = jnp.maximum(m_prev, jnp.max(s, axis=-1, keepdims=True))
    alpha = jnp.exp(m_prev - m_new)
    # Zero masked probabilities explicitly so fully-masked KV tiles are inert.
    p = jnp.where(allowed, jnp.exp(s - m_new), 0.0)

    l_sc[...] = alpha * l_sc[...] + jnp.sum(p, axis=-1, keepdims=True)
    acc_sc[...] = alpha * acc_sc[...] + jnp.dot(
        p.astype(v_ref.dtype), v_ref[0], preferred_element_type=jnp.float32)
    m_sc[...] = m_new

    @pl.when(ki == pl.num_programs(2) - 1)
    def _():
        inv = pl.reciprocal(l_sc[...] + 1e-30, approx=True)
        o_ref[0] = (acc_sc[...] * inv).astype(o_ref.dtype)


def flash_attention(q, k, v, qpos, qseq, kpos, kseq, *, scale, window,
                    tq=256, tk=512):
    """Online-softmax flash attention with GQA head folding.

    q:    [Hkv, T*groups, D]   (rows ordered token-major: r = t*groups + g)
    k, v: [Hkv, T, D]
    qpos/qseq: [T*groups, 1] int32; kpos/kseq: [1, T] int32
    """
    Hkv, TG, D = q.shape
    T = k.shape[1]
    groups = TG // T
    tq = _fit(T, tq)
    tk = _fit(T, tk)
    tqg = tq * groups
    return pl.pallas_call(
        functools.partial(_flash_attn_kernel, scale=scale, window=window),
        out_shape=jax.ShapeDtypeStruct((Hkv, TG, D), q.dtype),
        grid=(Hkv, T // tq, T // tk),
        in_specs=[
            pl.BlockSpec((tqg, 1), lambda h, qi, ki: (qi, 0)),
            pl.BlockSpec((tqg, 1), lambda h, qi, ki: (qi, 0)),
            pl.BlockSpec((1, tk), lambda h, qi, ki: (0, ki)),
            pl.BlockSpec((1, tk), lambda h, qi, ki: (0, ki)),
            pl.BlockSpec((1, tqg, D), lambda h, qi, ki: (h, qi, 0)),
            pl.BlockSpec((1, tk, D), lambda h, qi, ki: (h, ki, 0)),
            pl.BlockSpec((1, tk, D), lambda h, qi, ki: (h, ki, 0)),
        ],
        out_specs=pl.BlockSpec((1, tqg, D), lambda h, qi, ki: (h, qi, 0)),
        scratch_shapes=[pltpu.VMEM((tqg, 1), jnp.float32),
                        pltpu.VMEM((tqg, 1), jnp.float32),
                        pltpu.VMEM((tqg, D), jnp.float32)],
        compiler_params=_cparams("parallel", "parallel", "arbitrary"),
    )(qpos, qseq, kpos, kseq, q, k, v)


# ------------------------------- JAX glue ---------------------------------

@dataclass
class MistralConfig:
    vocab_size: int = 256
    hidden_size: int = 128
    num_heads: int = 4
    num_kv_heads: int = 2
    head_size: int = 32
    intermediate_size: int = 256
    num_layers: int = 2
    rms_norm_eps: float = 1e-5
    rope_theta: float = 10000.0
    sliding_window: Optional[int] = 4


def apply_rotary(x, cos, sin):
    # x: [T, heads, D]; cos/sin: [T, D//2] f32 (GPT-NeoX half-split, as TGI)
    d2 = x.shape[-1] // 2
    xf = x.astype(jnp.float32)
    x1, x2 = xf[..., :d2], xf[..., d2:]
    c = cos[:, None, :]
    s = sin[:, None, :]
    out = jnp.concatenate([x1 * c - x2 * s, x2 * c + x1 * s], axis=-1)
    return out.astype(x.dtype)


def attention_block(layer, cfg, x, cos, sin, qpos, qseq, kpos, kseq,
                    kv_cache_i, slots, prefill_cache_indices):
    nh, nkv, D = cfg.num_heads, cfg.num_kv_heads, cfg.head_size
    groups = nh // nkv
    T = x.shape[0]

    # fused input_layernorm + QKV projection
    qkv = rms_matmul(x, layer["input_ln"], layer["qkv_w"], cfg.rms_norm_eps)
    q = qkv[:, : nh * D].reshape(T, nh, D)
    kv = qkv[:, nh * D:].reshape(T, 2, nkv, D)
    k = kv[:, 0]
    v = kv[:, 1]
    q = apply_rotary(q, cos, sin)
    k = apply_rotary(k, cos, sin)

    # paged_attention.reshape_and_cache: scatter K/V into the slot-addressed cache
    if prefill_cache_indices is not None:
        k_c, v_c = k[prefill_cache_indices], v[prefill_cache_indices]
    else:
        k_c, v_c = k, v
    key_cache, value_cache = kv_cache_i
    key_cache = key_cache.at[slots].set(k_c.astype(key_cache.dtype))
    value_cache = value_cache.at[slots].set(v_c.astype(value_cache.dtype))

    scale = float(D) ** -0.5
    window = cfg.sliding_window if cfg.sliding_window is not None else -1

    # GQA fold: [T, H, D] -> [Hkv, T*groups, D], rows ordered (token, group)
    qh = (q.reshape(T, nkv, groups, D)
           .transpose(1, 0, 2, 3)
           .reshape(nkv, T * groups, D))
    kh = jnp.transpose(k, (1, 0, 2))   # [Hkv, T, D]
    vh = jnp.transpose(v, (1, 0, 2))
    oh = flash_attention(qh, kh, vh, qpos, qseq, kpos, kseq,
                         scale=scale, window=window)
    attn = (oh.reshape(nkv, T, groups, D)
              .transpose(1, 0, 2, 3)
              .reshape(T, nh * D))
    out = matmul(attn, layer["o_w"])
    return out, key_cache, value_cache


def mistral_forward(params, cfg: MistralConfig,
                    input_ids, position_ids, cu_seqlen_prefill,
                    kv_cache: List[Tuple[jnp.ndarray, jnp.ndarray]],
                    block_tables, slots, input_lengths, max_s,
                    prefill_cache_indices=None, lm_head_indices=None):
    del block_tables, max_s  # only used by the (unimplemented) decode path
    if prefill_cache_indices is not None:
        slots = slots[prefill_cache_indices]
    elif cfg.sliding_window is not None:
        input_lengths = jnp.minimum(input_lengths, cfg.sliding_window)

    # embedding
    h = params["embed"][input_ids]                        # [T, H] bf16

    # rotary tables (f32)
    D = cfg.head_size
    inv_freq = 1.0 / (cfg.rope_theta **
                      (jnp.arange(0, D, 2, dtype=jnp.float32) / D))
    freqs = position_ids.astype(jnp.float32)[:, None] * inv_freq[None, :]
    cos = jnp.cos(freqs)
    sin = jnp.sin(freqs)

    # varlen-prefill mask metadata (small vectors; the mask itself is built
    # inside the attention kernel — no dense [T,T] bias)
    T = input_ids.shape[0]
    groups = cfg.num_heads // cfg.num_kv_heads
    seq_ids = jnp.searchsorted(cu_seqlen_prefill[1:], jnp.arange(T),
                               side="right").astype(jnp.int32)
    pos32 = position_ids.astype(jnp.int32)
    qpos = jnp.repeat(pos32, groups).reshape(T * groups, 1)
    qseq = jnp.repeat(seq_ids, groups).reshape(T * groups, 1)
    kpos = pos32.reshape(1, T)
    kseq = seq_ids.reshape(1, T)

    residual = None
    new_kv_cache = []
    for i, layer in enumerate(params["layers"]):
        res = h if residual is None else h + residual
        attn_out, kc, vc = attention_block(layer, cfg, res, cos, sin,
                                           qpos, qseq, kpos, kseq,
                                           kv_cache[i], slots,
                                           prefill_cache_indices)
        new_kv_cache.append((kc, vc))
        res2 = attn_out + res
        # fused post_attention_layernorm + gate/up + SiLU*up, then down proj
        inter = rms_gate_up(res2, layer["post_ln"], layer["gate_w"],
                            layer["up_w"], cfg.rms_norm_eps)
        h = matmul(inter, layer["down_w"])
        residual = res2

    final = h + residual
    if lm_head_indices is not None:
        final = final[lm_head_indices]
    # fused final RMSNorm + lm_head (norm is per-row, so gather-then-norm == norm-then-gather)
    logits = rms_matmul(final, params["final_norm"], params["lm_head"],
                        cfg.rms_norm_eps)
    return logits, new_kv_cache


def init_params(key, cfg: MistralConfig):
    def nrm(k, shape, scale=0.02):
        return (scale * jax.random.normal(k, shape, dtype=jnp.float32)
                ).astype(jnp.bfloat16)

    keys = jax.random.split(key, 2 + cfg.num_layers)
    params = {
        "embed": nrm(keys[0], (cfg.vocab_size, cfg.hidden_size)),
        "lm_head": nrm(keys[1], (cfg.hidden_size, cfg.vocab_size)),
        "final_norm": jnp.ones((cfg.hidden_size,), jnp.float32),
        "layers": [],
    }
    qkv_out = (cfg.num_heads + 2 * cfg.num_kv_heads) * cfg.head_size
    for i in range(cfg.num_layers):
        lk = jax.random.split(keys[2 + i], 5)
        params["layers"].append(dict(
            qkv_w=nrm(lk[0], (cfg.hidden_size, qkv_out)),
            o_w=nrm(lk[1], (cfg.num_heads * cfg.head_size, cfg.hidden_size)),
            gate_w=nrm(lk[2], (cfg.hidden_size, cfg.intermediate_size)),
            up_w=nrm(lk[3], (cfg.hidden_size, cfg.intermediate_size)),
            down_w=nrm(lk[4], (cfg.intermediate_size, cfg.hidden_size)),
            input_ln=jnp.ones((cfg.hidden_size,), jnp.float32),
            post_ln=jnp.ones((cfg.hidden_size,), jnp.float32),
        ))
    return params


if __name__ == "__main__":
    cfg = MistralConfig()
    root = jax.random.PRNGKey(0)
    k_param, k_ids = jax.random.split(root)
    params = init_params(k_param, cfg)

    T = 8  # total packed tokens (single prefill sequence of length 8)
    input_ids = jax.random.randint(k_ids, (T,), 0, cfg.vocab_size)
    position_ids = jnp.arange(T, dtype=jnp.int32)
    cu_seqlen_prefill = jnp.array([0, T], dtype=jnp.int32)

    num_slots = 16
    kv_cache = [
        (jnp.zeros((num_slots, cfg.num_kv_heads, cfg.head_size), jnp.bfloat16),
         jnp.zeros((num_slots, cfg.num_kv_heads, cfg.head_size), jnp.bfloat16))
        for _ in range(cfg.num_layers)
    ]
    block_tables = jnp.zeros((1, 2), dtype=jnp.int32)
    slots = jnp.arange(T, dtype=jnp.int32)
    input_lengths = jnp.array([T], dtype=jnp.int32)
    max_s = T
    lm_head_indices = jnp.array([T - 1], dtype=jnp.int32)

    logits, new_kv_cache = mistral_forward(
        params, cfg, input_ids, position_ids, cu_seqlen_prefill, kv_cache,
        block_tables, slots, input_lengths, max_s,
        prefill_cache_indices=None, lm_head_indices=lm_head_indices)

    jax.block_until_ready(logits)
    assert logits.shape == (1, cfg.vocab_size)
    assert bool(jnp.all(jnp.isfinite(logits.astype(jnp.float32))))
    print("KERNEL_OK")
</pallas_src>

<mosaic_0001>
module attributes {stable_mosaic.version = 11 : i64} {
  func.func @_rms_matmul_kernel(%arg0: i32, %arg1: i32, %arg2: memref<8x128xbf16, #tpu.memory_space<vmem>>, %arg3: memref<1x128xf32, #tpu.memory_space<vmem>>, %arg4: memref<128x256xbf16, #tpu.memory_space<vmem>>, %arg5: memref<8x256xbf16, #tpu.memory_space<vmem>>) attributes {dimension_semantics = [#tpu.dimension_semantics<parallel>, #tpu.dimension_semantics<parallel>], iteration_bounds = array<i64: 1, 1>, scalar_prefetch = 0 : i64, scratch_operands = 0 : i64, tpu.core_type = #tpu.core_type<tc>, window_params = [{transform_indices = @transform_0, window_bounds = array<i64: 8, 128>}, {pipeline_mode = #tpu.pipeline_mode<synchronous>, transform_indices = @transform_1, window_bounds = array<i64: 1, 128>}, {transform_indices = @transform_2, window_bounds = array<i64: 128, 256>}, {transform_indices = @transform_3, window_bounds = array<i64: 8, 256>}]} {
    %c0 = arith.constant 0 : index
    %c0_0 = arith.constant 0 : index
    %0 = vector.load %arg2[%c0, %c0_0] : memref<8x128xbf16, #tpu.memory_space<vmem>>, vector<8x128xbf16>
    %1 = arith.extf %0 : vector<8x128xbf16> to vector<8x128xf32>
    %2 = arith.mulf %1, %1 : vector<8x128xf32>
    %cst = arith.constant dense<0.000000e+00> : vector<8xf32>
    %3 = vector.multi_reduction <add>, %2, %cst [1] : vector<8x128xf32> to vector<8xf32>
    %4 = vector.shape_cast %3 : vector<8xf32> to vector<8x1xf32>
    %cst_1 = arith.constant 1.280000e+02 : f32
    %5 = vector.broadcast %cst_1 : f32 to vector<8x1xf32>
    %6 = arith.divf %4, %5 : vector<8x1xf32>
    %cst_2 = arith.constant 9.99999974E-6 : f32
    %7 = vector.broadcast %cst_2 : f32 to vector<8x1xf32>
    %8 = arith.addf %6, %7 : vector<8x1xf32>
    %9 = math.rsqrt %8 : vector<8x1xf32>
    %10 = vector.broadcast %9 : vector<8x1xf32> to vector<8x128xf32>
    %11 = arith.mulf %1, %10 : vector<8x128xf32>
    %c0_3 = arith.constant 0 : index
    %c0_4 = arith.constant 0 : index
    %12 = vector.load %arg3[%c0_3, %c0_4] : memref<1x128xf32, #tpu.memory_space<vmem>>, vector<1x128xf32>
    %13 = vector.broadcast %12 : vector<1x128xf32> to vector<8x128xf32>
    %14 = arith.mulf %11, %13 : vector<8x128xf32>
    %15 = arith.truncf %14 : vector<8x128xf32> to vector<8x128xbf16>
    %c0_5 = arith.constant 0 : index
    %c0_6 = arith.constant 0 : index
    %16 = vector.load %arg4[%c0_5, %c0_6] : memref<128x256xbf16, #tpu.memory_space<vmem>>, vector<128x256xbf16>
    %cst_7 = arith.constant dense<0.000000e+00> : vector<8x256xf32>
    %17 = tpu.matmul %15, %16, %cst_7 {dimension_numbers = #tpu.dot_dimension_numbers<[1], [0], [0], [1], [0, 0, 1, 1], [], []>} : vector<8x128xbf16>, vector<128x256xbf16>, vector<8x256xf32> -> vector<8x256xf32>
    %18 = arith.truncf %17 : vector<8x256xf32> to vector<8x256xbf16>
    %c0_8 = arith.constant 0 : index
    %c0_9 = arith.constant 0 : index
    %19 = vector.load %arg5[%c0_8, %c0_9] : memref<8x256xbf16, #tpu.memory_space<vmem>>, vector<8x256xbf16>
    tpu.vector_store %arg5[%c0_8, %c0_9], %18 {strides = array<i32>} : memref<8x256xbf16, #tpu.memory_space<vmem>>, vector<8x256xbf16>,
    return
  }
  func.func @transform_0(%arg0: i32, %arg1: i32) -> (i32, i32) {
    %c0_i32 = arith.constant 0 : i32
    %c0_i32_0 = arith.constant 0 : i32
    return %arg0, %c0_i32 : i32, i32
  }
  func.func @transform_1(%arg0: i32, %arg1: i32) -> (i32, i32) {
    %c0_i32 = arith.constant 0 : i32
    %c0_i32_0 = arith.constant 0 : i32
    %c0_i32_1 = arith.constant 0 : i32
    return %c0_i32, %c0_i32_0 : i32, i32
  }
  func.func @transform_2(%arg0: i32, %arg1: i32) -> (i32, i32) {
    %c0_i32 = arith.constant 0 : i32
    %c0_i32_0 = arith.constant 0 : i32
    return %c0_i32, %arg1 : i32, i32
  }
  func.func @transform_3(%arg0: i32, %arg1: i32) -> (i32, i32) {
    %c0_i32 = arith.constant 0 : i32
    return %arg0, %arg1 : i32, i32
  }
}

</mosaic_0001>

<bundles_post_ra>
// kernel: tpu_custom_call.1
= control target key start
LH: loop header
LB: loop body
LE: loop exit
PB: predicated region body
PF: predicated region fallthrough
CT: control target
= control target key end

     0   :  { %8 = vsyncpa [#allocation3], 0  ;;  %s378_s0 = inlined_call_operand.hbm [shape: bf16[8,128], index: 0, kind: input, shape index: {}]   ;;  %s379_s1 = inlined_call_operand.vmem [shape: f32[1,128], index: 1, kind: input, shape index: {}]   ;;  %s380_s2 = inlined_call_operand.hbm [shape: bf16[128,256], index: 2, kind: input, shape index: {}]   ;;  %s381_s3 = inlined_call_operand.hbm [shape: bf16[8,256], index: 3, kind: output, shape index: {}]  }
   0x1   :  { %9 = vsyncpa [#allocation6], 0 }
   0x2   :  { %10 = vsyncpa [#allocation4], 0  ;;  %s340_s12 = smov [#allocation2]   ;;  %s341_s14 = smov [#allocation5]  }
   0x3   :  { %s17_s13 = sshll.u32 %s340_s12, 4  ;;  %s28_s15 = sshll.u32 %s341_s14, 4  ;;  %s18_s13 = int_to_ptr.vmem [resolvable:$true] %s17_s13  ;;  %s29_s15 = int_to_ptr.vmem [resolvable:$true] %s28_s15 }
   0x4   :  { %s282_s16 = scalar_lea.vmem %s18_s13, 64  ;;  %p287_p1 = scmp.lt.s32.totalorder %s18_s13, %s18_s13 }
   0x5   :  { %p283_p0 = scmp.ne.s32.totalorder %s18_s13, %s282_s16  ;;  %p288_p2 = scmp.lt.s32.totalorder %s282_s16, %s282_s16 }
   0x7   :  { %p289_p3 = por %p288_p2, %p287_p1 }
   0x9   :  { %p290_p4 = pnand %p289_p3, %p283_p0 }
   0xb   :  { %293 = shalt.err (!%p290_p4)
}
   0xc   :  { %20 = dma.hbm_to_vmem [thread:$0]  %s378_s0, 64, %s18_s13, [#allocation3]  }
   0xd   :  { %s302_s19 = scalar_lea.vmem %s29_s15, 2048  ;;  %p307_p6 = scmp.lt.s32.totalorder %s29_s15, %s29_s15 }
   0xe   :  { %p303_p5 = scmp.ne.s32.totalorder %s29_s15, %s302_s19  ;;  %p308_p7 = scmp.lt.s32.totalorder %s302_s19, %s302_s19 }
  0x10   :  { %p309_p8 = por %p308_p7, %p307_p6 }
  0x12   :  { %p310_p9 = pnand %p309_p8, %p303_p5 }
  0x14   :  { %313 = shalt.err (!%p310_p9)
}
  0x15   :  { %s342_s20 = smov 128   ;;  %s343_s21 = smov 8  }
  0x16   :  { %34 = dma.hbm_to_vmem [thread:$0]  %s380_s2, 2048, %s29_s15, [#allocation6], %s342_s20, %s342_s20, %s343_s21  }
  0x17   :  { %334 = dma.done.wait [#allocation3], 64  }
  0x18   :  { %335 = vsyncadd [#allocation3], 4294967232 }
  0x19   :  { %336 = dma.done.wait [#allocation6], 2048  }
  0x1a   :  { %337 = vsyncadd [#allocation6], 4294965248  ;;  %v42_v0 = vld [vmem:[#allocation2] sm:$0xf]  ;;  %v250_v3 = vld [vmem:[#allocation5 + $0x70] ss:$8 sps:$4 sm:$0xff]  }
  0x1b   :  { %v43_v1 = vunpack.c.l.bf16 %v42_v0  ;;  %v248_v2 = vld [vmem:[#allocation5 + $0x74] ss:$8 sps:$4 sm:$0xff]   ;;  %v251_v4 = vld [vmem:[#allocation5 + $0x64] ss:$8 sps:$4 sm:$0xff]   ;;  %v253_v5 = vld [vmem:[#allocation5 + $0x60] ss:$8 sps:$4 sm:$0xff]  }
  0x1c   :  { %157 = vmatprep.subr.bf16.mxu0 %v248_v2  ;;  %v254_v7 = vld [vmem:[#allocation5 + $0x54] ss:$8 sps:$4 sm:$0xff]   ;;  %v256_v8 = vld [vmem:[#allocation5 + $0x50] ss:$8 sps:$4 sm:$0xff]   ;;  %v257_v9 = vld [vmem:[#allocation5 + $0x44] ss:$8 sps:$4 sm:$0xff]  }
  0x1d   :  { %v44_v6 = vmul.f32 %v43_v1, %v43_v1  ;;  %158 = vmatpush1.bf16.msra.mxu0 %v250_v3  ;;  %v259_v10 = vld [vmem:[#allocation5 + $0x40] ss:$8 sps:$4 sm:$0xff]   ;;  %v260_v11 = vld [vmem:[#allocation5 + $0x34] ss:$8 sps:$4 sm:$0xff]   ;;  %v262_v12 = vld [vmem:[#allocation5 + $0x30] ss:$8 sps:$4 sm:$0xff]  }
  0x1e   :  { %159 = vmatprep.subr.bf16.mxu0 %v251_v4  ;;  %v263_v13 = vld [vmem:[#allocation5 + $0x24] ss:$8 sps:$4 sm:$0xff]   ;;  %v344_v14 = vmov 0   ;;  %v265_v15 = vld [vmem:[#allocation5 + $0x20] ss:$8 sps:$4 sm:$0xff]   ;;  %s345_s24 = smov [#allocation7]  }
  0x1f   :  { %45 = vadd.xlane.f32.xlu0 %v44_v6  ;;  %189 = vmatprep.mubr.bf16.mxu0 %v344_v14  ;;  %v266_v16 = vld [vmem:[#allocation5 + $0x14] ss:$8 sps:$4 sm:$0xff]   ;;  %v268_v17 = vld [vmem:[#allocation5 + $0x10] ss:$8 sps:$4 sm:$0xff]   ;;  %v269_v18 = vld [vmem:[#allocation5 + $0x4] ss:$8 sps:$4 sm:$0xff]  }
  0x20   :  { %v271_v19 = vld [vmem:[#allocation5] ss:$8 sps:$4 sm:$0xff]   ;;  %v223_v24 = vld [vmem:[%s379_s1] ss:$0 sm:$0xff]  ;;  %s213_s25 = sshll.u32 %s345_s24, 4  ;;  %s214_s25 = int_to_ptr.vmem [resolvable:$true] %s213_s25 }
  0x21   :  { %160 = vmatpush1.bf16.msra.mxu0 %v253_v5  ;;  %s314_s26 = scalar_lea.vmem %s214_s25, 128  ;;  %p319_p11 = scmp.lt.s32.totalorder %s214_s25, %s214_s25 }
  0x22   :  { %161 = vmatprep.subr.bf16.mxu0 %v254_v7  ;;  %p315_p10 = scmp.ne.s32.totalorder %s214_s25, %s314_s26  ;;  %p320_p12 = scmp.lt.s32.totalorder %s314_s26, %s314_s26 }
  0x24   :  { %p321_p13 = por %p320_p12, %p319_p11 }
  0x25   :  { %162 = vmatpush1.bf16.msra.mxu0 %v256_v8 }
  0x26   :  { %163 = vmatprep.subr.bf16.mxu0 %v257_v9  ;;  %p322_p0 = pnand %p321_p13, %p315_p10 }
  0x29   :  { %164 = vmatpush1.bf16.msra.mxu0 %v259_v10 }
  0x2a   :  { %165 = vmatprep.subr.bf16.mxu0 %v260_v11 }
  0x2d   :  { %166 = vmatpush1.bf16.msra.mxu0 %v262_v12 }
  0x2e   :  { %167 = vmatprep.subr.bf16.mxu0 %v263_v13 }
  0x31   :  { %168 = vmatpush1.bf16.msra.mxu0 %v265_v15 }
  0x32   :  { %169 = vmatprep.subr.bf16.mxu0 %v266_v16 }
  0x35   :  { %170 = vmatpush1.bf16.msra.mxu0 %v268_v17 }
  0x36   :  { %171 = vmatprep.subr.bf16.mxu0 %v269_v18 }
  0x39   :  { %172 = vmatpush1.bf16.msra.mxu0 %v271_v19 }
  0xa8   :  { %v46_v20 = vpop.xlane.xlu0 %45 }
  0xa9   :  { %v48_v21 = vmul.f32 0.0078125, %v46_v20 }
  0xab   :  { %v49_v22 = vadd.f32 1e-05, %v48_v21 }
  0xad   :  { %272 = vrsqrt.f32 %v49_v22 }
  0xba   :  { %v273_v23 = vpop.eup %272 }
  0xbb   :  { %v51_v25 = vmul.f32 %v273_v23, %v43_v1 }
  0xbd   :  { %v59_v26 = vmul.f32 %v223_v24, %v51_v25 }
  0xbf   :  { %v60_v27 = vpack.c.bf16 %v59_v26, %v59_v26 }
  0xc1   :  { %190 = vmatmul.mubr.bf16.vlgmr.msra.gmra.mxu0 %v60_v27 }
 0x181   :  { %v191_v28 = vpop.f32.mrf.mxu0 }
 0x183   :  { %v193_v29 = vpop.f32.mrf.mxu0 }
 0x184   :  { %v241_v30 = vpack.c.bf16 %v193_v29, %v191_v28 }
 0x185   :  { %v195_v31 = vpop.f32.mrf.mxu0 }
 0x186   :  { %206 = vst [vmem:[#allocation7] sm:$0xff] %v241_v30 }
 0x187   :  { %v196_v32 = vpop.f32.mrf.mxu0 }
 0x188   :  { %325 = shalt.err (!%p322_p0)
}
 0x189   :  { %216 = dma.vmem_to_hbm [thread:$0]  %s214_s25, 128, %s381_s3, [#allocation4]  }
 0x18a   :  { %338 = dma.done.wait [#allocation4], 128  }
 0x18b   :  { %339 = vsyncadd [#allocation4], 4294967168 }
 0x18c   :  { %220 = vsyncpa [#allocation3], 1 }
 0x18d   :  { %221 = vsyncpa [#allocation6], 1 }
 0x18e   :  { %222 = vsyncpa [#allocation4], 1 }

</bundles_post_ra>
